<compile_context>
chip_gen: v7x
topology: tpu7x:2x2x1
jax: 0.10.0
libtpu: 0.0.40
codegen_flags: <defaults>
</compile_context>

<pallas_src>
import functools

import jax
import jax.numpy as jnp
from jax.experimental import pallas as pl
from jax.experimental.pallas import tpu as pltpu


# ----------------------------------------------------------------------------
# Pallas kernel: fused (grouped) matmul + bias + activation
# ----------------------------------------------------------------------------
def _gmm_bias_act_kernel(x_ref, w_ref, b_ref, o_ref, *, act, slope):
    """One (tm, K) x (K, N) tile of group g: bf16 MXU matmul, f32 epilogue."""
    y = jnp.dot(x_ref[0], w_ref[0], preferred_element_type=jnp.float32)
    y = y + b_ref[...]                       # (tm, N) + (1, N)
    if act == "leaky_relu":
        y = jnp.where(y > 0, y, slope * y)
    elif act == "sigmoid":
        y = 1.0 / (1.0 + jnp.exp(-y))
    o_ref[0] = y.astype(o_ref.dtype)


def _ceil_to(x, m):
    return ((x + m - 1) // m) * m


def _pick_tm(M, K, min_m_blocks):
    """Largest M tile (<= ~4 MiB bf16 activations) with small padding waste.

    Keeps >= `min_m_blocks` M blocks (for megacore) whenever possible.
    """
    k_eff = max(K, 128)                      # lane padding in VMEM
    budget = 4 * 1024 * 1024                 # bytes per activation tile
    mp8 = _ceil_to(M, 8)
    best = None
    for tm in (2048, 1024, 512, 256, 128, 64, 32, 16):
        if tm * k_eff * 2 > budget:
            continue
        if mp8 < min_m_blocks * tm:
            continue
        if best is None:
            best = tm
        # Prefer the biggest tile whose zero-row padding stays under ~M/8.
        if _ceil_to(M, tm) - M <= max(M // 8, 8):
            return tm
    return best if best is not None else mp8


def grouped_matmul_bias_act(x, w, b, act="none", slope=0.2,
                            out_dtype=jnp.float32):
    """(G, M, K) @ (G, K, N) + b(N) with fused activation.

    K / N are never padded to 128 in HBM; only M is tiled (and padded to the
    tile).  Grid = (G, M_blocks); weights are re-fetched once per group.
    """
    G, M, K = x.shape
    Gw, Kw, N = w.shape
    assert (Gw, Kw) == (G, K)
    Kp = _ceil_to(K, 8)
    tm = _pick_tm(M, Kp, min_m_blocks=2 if G == 1 else 1)
    Mp = _ceil_to(M, tm)

    xb = x.astype(jnp.bfloat16)
    if (Mp, Kp) != (M, K):
        xb = jnp.pad(xb, ((0, 0), (0, Mp - M), (0, Kp - K)))
    wb = w.astype(jnp.bfloat16)
    if Kp != K:
        wb = jnp.pad(wb, ((0, 0), (0, Kp - K), (0, 0)))
    bb = b.astype(jnp.float32).reshape(1, N)

    kern = functools.partial(_gmm_bias_act_kernel, act=act, slope=slope)
    out = pl.pallas_call(
        kern,
        out_shape=jax.ShapeDtypeStruct((G, Mp, N), out_dtype),
        grid_spec=pltpu.PrefetchScalarGridSpec(
            num_scalar_prefetch=0,
            grid=(G, Mp // tm),
            in_specs=[
                pl.BlockSpec((1, tm, Kp), lambda g, i: (g, i, 0)),
                pl.BlockSpec((1, Kp, N), lambda g, i: (g, 0, 0)),
                pl.BlockSpec((1, N), lambda g, i: (0, 0)),
            ],
            out_specs=pl.BlockSpec((1, tm, N), lambda g, i: (g, i, 0)),
        ),
        compiler_params=pltpu.CompilerParams(
            dimension_semantics=("parallel", "parallel"),
        ),
    )(xb, wb, bb)
    return out[:, :M] if Mp != M else out


def matmul_bias_act(x, w, b, act="none", slope=0.2, out_dtype=jnp.float32):
    """Ungrouped (M, K) @ (K, N) + b convenience wrapper (G=1)."""
    return grouped_matmul_bias_act(x[None], w[None], b, act=act, slope=slope,
                                   out_dtype=out_dtype)[0]


# ----------------------------------------------------------------------------
# Convolutions (NHWC activations, PyTorch weight layouts)
# ----------------------------------------------------------------------------
def conv2d_nhwc(x, w, b, stride, pad, act, slope=0.2, out_dtype=jnp.float32):
    """x: (N,H,W,C), w: (OC, IC, kh, kw) (PyTorch Conv2d layout)."""
    N, H, W, C = x.shape
    OC, IC, kh, kw = w.shape
    xb = x.astype(jnp.bfloat16)
    if pad:
        xb = jnp.pad(xb, ((0, 0), (pad, pad), (pad, pad), (0, 0)))
    Hp, Wp = H + 2 * pad, W + 2 * pad
    OH = (Hp - kh) // stride + 1
    OW = (Wp - kw) // stride + 1
    cols = []
    for ky in range(kh):
        for kx in range(kw):
            cols.append(xb[:, ky:ky + stride * OH:stride, kx:kx + stride * OW:stride, :])
    patches = jnp.stack(cols, axis=3).reshape(N * OH * OW, kh * kw * IC)
    wm = w.transpose(2, 3, 1, 0).reshape(kh * kw * IC, OC)     # (ky,kx,ic) x oc
    y = matmul_bias_act(patches, wm, b, act=act, slope=slope, out_dtype=out_dtype)
    return y.reshape(N, OH, OW, OC)


# Per-output-phase taps for ConvTranspose2d(k=4, stride=2, pad=1):
#   even output rows use kernel rows {3,1} at input offsets {-1,0},
#   odd  output rows use kernel rows {2,0} at input offsets {0,+1}.
_TCONV_TAPS = {0: ((-1, 3), (0, 1)), 1: ((0, 2), (1, 0))}


def _conv_transpose_s2k4p1_nhwc(x, w, b, act, slope, out_dtype):
    """Sub-pixel ConvTranspose2d (k=4, s=2, p=1): 4 dense stride-1 convs.

    All 4 output phases run in ONE grouped pallas_call, then interleave.
    """
    N, H, W, C = x.shape
    IC, OC, kh, kw = w.shape
    xb = x.astype(jnp.bfloat16)
    xp = jnp.pad(xb, ((0, 0), (1, 1), (1, 1), (0, 0)))
    phase_patches, phase_weights = [], []
    for ry in (0, 1):
        for rx in (0, 1):
            cols = []
            for (dy, ky) in _TCONV_TAPS[ry]:
                for (dx, kx) in _TCONV_TAPS[rx]:
                    cols.append(xp[:, 1 + dy:1 + dy + H, 1 + dx:1 + dx + W, :])
            phase_patches.append(
                jnp.stack(cols, axis=3).reshape(N * H * W, 4 * IC))
            ky_list = [t[1] for t in _TCONV_TAPS[ry]]
            kx_list = [t[1] for t in _TCONV_TAPS[rx]]
            w_sub = w[:, :, ky_list, :][:, :, :, kx_list]       # (IC, OC, 2, 2)
            phase_weights.append(w_sub.transpose(2, 3, 0, 1).reshape(4 * IC, OC))
    patches_g = jnp.stack(phase_patches, axis=0)                # (4, M, 4*IC)
    weights_g = jnp.stack(phase_weights, axis=0)                # (4, 4*IC, OC)
    y = grouped_matmul_bias_act(patches_g, weights_g, b, act=act, slope=slope,
                                out_dtype=out_dtype)            # (4, M, OC)
    y = y.reshape(2, 2, N, H, W, OC)                            # (ry, rx, ...)
    out = jnp.transpose(y, (2, 3, 0, 4, 1, 5))                  # (N, H, 2, W, 2, OC)
    return out.reshape(N, 2 * H, 2 * W, OC)


def conv_transpose2d_nhwc(x, w, b, stride, pad, act, slope=0.2,
                          out_dtype=jnp.float32):
    """x: (N,H,W,C), w: (IC, OC, kh, kw) (PyTorch ConvTranspose2d layout)."""
    IC, OC, kh, kw = w.shape
    if stride == 2 and kh == 4 and kw == 4 and pad == 1:
        return _conv_transpose_s2k4p1_nhwc(x, w, b, act, slope, out_dtype)
    # General fallback: zero-dilated input + flipped-kernel regular conv.
    N, H, W, C = x.shape
    if stride > 1:
        xd = jnp.zeros((N, (H - 1) * stride + 1, (W - 1) * stride + 1, C), x.dtype)
        xd = xd.at[:, ::stride, ::stride, :].set(x)
    else:
        xd = x
    w_conv = jnp.flip(w, axis=(2, 3)).transpose(1, 0, 2, 3)     # (OC, IC, kh, kw)
    return conv2d_nhwc(xd, w_conv, b, stride=1, pad=kh - 1 - pad, act=act,
                       slope=slope, out_dtype=out_dtype)


# ----------------------------------------------------------------------------
# VAE model (static layer config, arrays-only params pytree)
# ----------------------------------------------------------------------------
def _enc_cfg(latent_dim, nf):
    return (
        (3, nf, 3, 1, 1),
        (nf, 2 * nf, 4, 2, 1),
        (2 * nf, 4 * nf, 4, 2, 1),
        (4 * nf, 8 * nf, 4, 2, 1),
        (8 * nf, 16 * nf, 4, 2, 1),
        (16 * nf, 32 * nf, 4, 2, 1),
        (32 * nf, 2 * latent_dim, 7, 1, 0),
    )


def _dec_cfg(latent_dim, nf):
    return (
        (latent_dim, 32 * nf, 7, 1, 0),
        (32 * nf, 16 * nf, 4, 2, 1),
        (16 * nf, 8 * nf, 4, 2, 1),
        (8 * nf, 4 * nf, 4, 2, 1),
        (4 * nf, 2 * nf, 4, 2, 1),
        (2 * nf, nf, 4, 2, 1),
        (nf, 3, 3, 1, 1),
    )


def init_vae_params(latent_dim, nf, key):
    """Deterministic synthetic parameters (shapes match the PyTorch module)."""
    enc_cfg = _enc_cfg(latent_dim, nf)
    dec_cfg = _dec_cfg(latent_dim, nf)
    keys = jax.random.split(key, len(enc_cfg) + len(dec_cfg))
    enc, dec = [], []
    for idx, (ic, oc, k, _, _) in enumerate(enc_cfg):
        std = 1.0 / jnp.sqrt(ic * k * k)
        w = std * jax.random.normal(keys[idx], (oc, ic, k, k), jnp.float32)
        enc.append((w, jnp.zeros((oc,), jnp.float32)))
    for idx, (ic, oc, k, _, _) in enumerate(dec_cfg):
        std = 1.0 / jnp.sqrt(ic * k * k)
        w = std * jax.random.normal(keys[len(enc_cfg) + idx], (ic, oc, k, k), jnp.float32)
        dec.append((w, jnp.zeros((oc,), jnp.float32)))
    return {"enc": enc, "dec": dec}


def vae_forward(params, x, eps_key, *, latent_dim, nf, training=True):
    """x: NCHW (like PyTorch).  Returns (recon NCHW, mu, logvar)."""
    B = x.shape[0]
    enc_cfg = _enc_cfg(latent_dim, nf)
    dec_cfg = _dec_cfg(latent_dim, nf)
    bf16 = jnp.bfloat16

    # NCHW -> NHWC once; the whole network runs channels-last.
    h = jnp.transpose(x, (0, 2, 3, 1))

    # ---- encoder: all layers LeakyReLU(0.2); intermediates in bf16 ----
    n_enc = len(enc_cfg)
    for li, ((w, b), (_, _, _, s, p)) in enumerate(zip(params["enc"], enc_cfg)):
        odt = jnp.float32 if li == n_enc - 1 else bf16
        h = conv2d_nhwc(h, w, b, stride=s, pad=p, act="leaky_relu", slope=0.2,
                        out_dtype=odt)

    # h: (B, 1, 1, 2*latent_dim) -- NOTE: LeakyReLU is applied before the
    # mu/logvar split, exactly as in the PyTorch nn.Sequential encoder.
    mu = h[..., :latent_dim].reshape(B, latent_dim)
    logvar = h[..., latent_dim:].reshape(B, latent_dim)

    # ---- reparameterize (plain jnp: tiny (B, latent_dim) tensor) ----
    if training:
        eps = jax.random.normal(eps_key, mu.shape, mu.dtype)
        z = eps * jnp.exp(0.5 * logvar) + mu
    else:
        z = mu

    # ---- decoder: LeakyReLU on all but last, Sigmoid on last ----
    h = z.reshape(B, 1, 1, latent_dim)
    for (w, b), (_, _, _, s, p) in zip(params["dec"][:-1], dec_cfg[:-1]):
        h = conv_transpose2d_nhwc(h, w, b, stride=s, pad=p, act="leaky_relu",
                                  slope=0.2, out_dtype=bf16)
    (w, b), (_, _, _, s, p) = params["dec"][-1], dec_cfg[-1]
    h = conv_transpose2d_nhwc(h, w, b, stride=s, pad=p, act="sigmoid",
                              out_dtype=jnp.float32)

    recon = jnp.transpose(h, (0, 3, 1, 2))              # NHWC -> NCHW
    return recon, mu.reshape(B, latent_dim, 1, 1), logvar.reshape(B, latent_dim, 1, 1)


# ----------------------------------------------------------------------------
# Pure-XLA references (used only for the small in-script correctness checks)
# ----------------------------------------------------------------------------
def _ref_conv2d(x, w, b, stride, pad):
    w_hwio = jnp.transpose(w, (2, 3, 1, 0))
    y = jax.lax.conv_general_dilated(
        x, w_hwio, window_strides=(stride, stride),
        padding=[(pad, pad), (pad, pad)],
        dimension_numbers=("NHWC", "HWIO", "NHWC"))
    return y + b.reshape(1, 1, 1, -1)


def _ref_conv_transpose2d(x, w, b, stride, pad):
    kh = w.shape[2]
    w_hwio = jnp.transpose(jnp.flip(w, axis=(2, 3)), (2, 3, 0, 1))
    y = jax.lax.conv_general_dilated(
        x, w_hwio, window_strides=(1, 1),
        padding=[(kh - 1 - pad, kh - 1 - pad)] * 2,
        lhs_dilation=(stride, stride),
        dimension_numbers=("NHWC", "HWIO", "NHWC"))
    return y + b.reshape(1, 1, 1, -1)


# ----------------------------------------------------------------------------
if __name__ == "__main__":
    # ---- small self-checks of the Pallas conv lowerings (bf16 tolerance) ----
    kc = jax.random.split(jax.random.PRNGKey(7), 5)
    xt = jax.random.normal(kc[0], (1, 6, 6, 5), jnp.float32)
    wt = 0.3 * jax.random.normal(kc[1], (7, 5, 4, 4), jnp.float32)      # Conv2d 5->7
    bt = 0.1 * jax.random.normal(kc[2], (7,), jnp.float32)
    got = conv2d_nhwc(xt, wt, bt, stride=2, pad=1, act="none")
    ref = _ref_conv2d(xt, wt, bt, 2, 1)
    assert bool(jnp.allclose(got, ref, rtol=0.1, atol=0.1))

    wtt = 0.3 * jax.random.normal(kc[3], (5, 7, 4, 4), jnp.float32)     # ConvT 5->7, s=2
    got = conv_transpose2d_nhwc(xt, wtt, bt, stride=2, pad=1, act="none")
    ref = _ref_conv_transpose2d(xt, wtt, bt, 2, 1)
    assert bool(jnp.allclose(got, ref, rtol=0.1, atol=0.1))

    wts = 0.3 * jax.random.normal(kc[4], (5, 7, 3, 3), jnp.float32)     # ConvT 5->7, s=1
    got = conv_transpose2d_nhwc(xt, wts, bt, stride=1, pad=1, act="none")
    ref = _ref_conv_transpose2d(xt, wts, bt, 1, 1)
    assert bool(jnp.allclose(got, ref, rtol=0.1, atol=0.1))

    # ---- full VAE forward ----
    nf = 4
    latent_dim = 8
    batch = 2
    # The architecture (five stride-2 convs then a 7x7 valid conv) requires
    # 224x224 inputs, as documented in the PyTorch module.
    x = jax.random.normal(jax.random.PRNGKey(0), (batch, 3, 224, 224), jnp.float32)
    params = init_vae_params(latent_dim, nf, jax.random.PRNGKey(42))

    fwd = jax.jit(functools.partial(
        vae_forward, latent_dim=latent_dim, nf=nf, training=True))
    recon, mu, logvar = fwd(params, x, jax.random.PRNGKey(1))
    jax.block_until_ready((recon, mu, logvar))

    assert recon.shape == (batch, 3, 224, 224)
    assert mu.shape == (batch, latent_dim, 1, 1)
    assert logvar.shape == (batch, latent_dim, 1, 1)
    assert bool(jnp.all(jnp.isfinite(recon)))
    assert bool(jnp.all((recon >= 0.0) & (recon <= 1.0)))

    print("KERNEL_OK")
</pallas_src>

<mosaic_0001>
module attributes {stable_mosaic.version = 11 : i64} {
  func.func @_gmm_bias_act_kernel(%arg0: i32, %arg1: i32, %arg2: memref<1x16x80xbf16, #tpu.memory_space<vmem>>, %arg3: memref<1x80x7xbf16, #tpu.memory_space<vmem>>, %arg4: memref<1x7xf32, #tpu.memory_space<vmem>>, %arg5: memref<1x16x7xf32, #tpu.memory_space<vmem>>) attributes {dimension_semantics = [#tpu.dimension_semantics<parallel>, #tpu.dimension_semantics<parallel>], iteration_bounds = array<i64: 1, 1>, scalar_prefetch = 0 : i64, scratch_operands = 0 : i64, tpu.core_type = #tpu.core_type<tc>, window_params = [{transform_indices = @transform_0, window_bounds = array<i64: 1, 16, 80>}, {transform_indices = @transform_1, window_bounds = array<i64: 1, 80, 7>}, {pipeline_mode = #tpu.pipeline_mode<synchronous>, transform_indices = @transform_2, window_bounds = array<i64: 1, 7>}, {transform_indices = @transform_3, window_bounds = array<i64: 1, 16, 7>}]} {
    %c0 = arith.constant 0 : index
    %c0_0 = arith.constant 0 : index
    %c0_1 = arith.constant 0 : index
    %0 = vector.load %arg2[%c0, %c0_0, %c0_1] : memref<1x16x80xbf16, #tpu.memory_space<vmem>>, vector<1x16x80xbf16>
    %1 = vector.shape_cast %0 : vector<1x16x80xbf16> to vector<16x80xbf16>
    %c0_2 = arith.constant 0 : index
    %c0_3 = arith.constant 0 : index
    %c0_4 = arith.constant 0 : index
    %2 = vector.load %arg3[%c0_2, %c0_3, %c0_4] : memref<1x80x7xbf16, #tpu.memory_space<vmem>>, vector<1x80x7xbf16>
    %3 = vector.shape_cast %2 : vector<1x80x7xbf16> to vector<80x7xbf16>
    %cst = arith.constant dense<0.000000e+00> : vector<16x7xf32>
    %4 = tpu.matmul %1, %3, %cst {dimension_numbers = #tpu.dot_dimension_numbers<[1], [0], [0], [1], [0, 0, 1, 1], [], []>} : vector<16x80xbf16>, vector<80x7xbf16>, vector<16x7xf32> -> vector<16x7xf32>
    %c0_5 = arith.constant 0 : index
    %c0_6 = arith.constant 0 : index
    %5 = vector.load %arg4[%c0_5, %c0_6] : memref<1x7xf32, #tpu.memory_space<vmem>>, vector<1x7xf32>
    %6 = vector.broadcast %5 : vector<1x7xf32> to vector<16x7xf32>
    %7 = arith.addf %4, %6 : vector<16x7xf32>
    %c0_7 = arith.constant 0 : index
    %c0_8 = arith.constant 0 : index
    %c0_9 = arith.constant 0 : index
    %8 = vector.load %arg5[%c0_7, %c0_8, %c0_9] : memref<1x16x7xf32, #tpu.memory_space<vmem>>, vector<1x16x7xf32>
    %9 = vector.shape_cast %8 : vector<1x16x7xf32> to vector<16x7xf32>
    %10 = vector.shape_cast %7 : vector<16x7xf32> to vector<1x16x7xf32>
    tpu.vector_store %arg5[%c0_7, %c0_8, %c0_9], %10 {strides = array<i32>} : memref<1x16x7xf32, #tpu.memory_space<vmem>>, vector<1x16x7xf32>,
    return
  }
  func.func @transform_0(%arg0: i32, %arg1: i32) -> (i32, i32, i32) {
    %c0_i32 = arith.constant 0 : i32
    %c0_i32_0 = arith.constant 0 : i32
    return %arg0, %arg1, %c0_i32 : i32, i32, i32
  }
  func.func @transform_1(%arg0: i32, %arg1: i32) -> (i32, i32, i32) {
    %c0_i32 = arith.constant 0 : i32
    %c0_i32_0 = arith.constant 0 : i32
    %c0_i32_1 = arith.constant 0 : i32
    return %arg0, %c0_i32, %c0_i32_0 : i32, i32, i32
  }
  func.func @transform_2(%arg0: i32, %arg1: i32) -> (i32, i32) {
    %c0_i32 = arith.constant 0 : i32
    %c0_i32_0 = arith.constant 0 : i32
    %c0_i32_1 = arith.constant 0 : i32
    return %c0_i32, %c0_i32_0 : i32, i32
  }
  func.func @transform_3(%arg0: i32, %arg1: i32) -> (i32, i32, i32) {
    %c0_i32 = arith.constant 0 : i32
    %c0_i32_0 = arith.constant 0 : i32
    return %arg0, %arg1, %c0_i32 : i32, i32, i32
  }
}

</mosaic_0001>

<bundles_post_ra>
// kernel: tpu_custom_call.1
= control target key start
LH: loop header
LB: loop body
LE: loop exit
PB: predicated region body
PF: predicated region fallthrough
CT: control target
= control target key end

     0   :  { %v157_v0 = vmov 0.0   ;;  %vm158_vm0 = vmmov 0   ;;  %vm69_vm1 = vcmask 654336   ;;  %vm114_vm2 = vcmask 56320   ;;  %s206_s1 = inlined_call_operand.vmem [shape: bf16[1,80,7], index: 1, kind: input, shape index: {}]   ;;  %s207_s0 = inlined_call_operand.vmem [shape: bf16[1,16,80], index: 0, kind: input, shape index: {}]   ;;  %s208_s2 = inlined_call_operand.vmem [shape: f32[1,7], index: 2, kind: input, shape index: {}]   ;;  %s209_s3 = inlined_call_operand.vmem [shape: f32[1,16,7], index: 3, kind: output, shape index: {}]  }
   0x1   :  { %135 = vmatprep.subr.bf16.mxu0 %v157_v0  ;;  %v151_v1 = vld [vmem:[%s206_s1] sm:$0xff]   ;;  %145 = vmatprep.mubr.msk.bf16.mxu0 %vm158_vm0, %v157_v0  ;;  %v152_v2 = vld [vmem:[%s206_s1 + $0x8] sm:$0xff]   ;;  %v153_v3 = vld [vmem:[%s206_s1 + $0x10] sm:$0xff]  }
   0x2   :  { %136 = vmatpush3.bf16.msra.mxu0 %v151_v1  ;;  %v154_v4 = vld [vmem:[%s206_s1 + $0x18] sm:$0xff]   ;;  %v155_v5 = vld [vmem:[%s206_s1 + $0x20] sm:$0xff]  }
   0x3   :  { %137 = vmatprep.subr.bf16.mxu0 %v157_v0  ;;  %v156_v6 = vld [vmem:[%s207_s0] sm:$0xff]  }
   0x4   :  { %v121_v7 = vld [vmem:[%s208_s2] ss:$0 sm:$0xff] }
   0x6   :  { %138 = vmatpush3.bf16.msra.mxu0 %v152_v2 }
   0x7   :  { %139 = vmatprep.subr.bf16.mxu0 %v157_v0 }
   0xa   :  { %140 = vmatpush3.bf16.msra.mxu0 %v153_v3 }
   0xb   :  { %141 = vmatprep.subr.bf16.mxu0 %v157_v0 }
   0xe   :  { %142 = vmatpush3.bf16.msra.mxu0 %v154_v4 }
   0xf   :  { %143 = vmatprep.subr.bf16.mxu0 %v157_v0 }
  0x12   :  { %144 = vmatpush3.bf16.msra.mxu0 %v155_v5 }
  0x15   :  { %146 = vmatmul.mubr.msk.bf16.vlgmr.msra.gmra.mrb[0].mxu0 %vm69_vm1, %v156_v6 }
  0xe8   :  { %v107_v8 = vpop.f32.mrb[0].mxu0 }
  0xe9   :  { %v108_v9 = vadd.f32 %v121_v7, %v107_v8  ;;  %v147_v10 = vpop.f32.mrb[1].mxu0 }
  0xea   :  { %v110_v11 = vpop.f32.mrb[2].mxu0 }
  0xeb   :  { %115 = vst.msk [vmem:[%s209_s3] sm:$0xff] %vm114_vm2, %v108_v9  ;;  %v111_v12 = vadd.f32 %v121_v7, %v110_v11  ;;  %v148_v13 = vpop.f32.mrb[3].mxu0 }
  0xed   :  { %116 = vst.msk [vmem:[%s209_s3 + $0x8] sm:$0xff] %vm114_vm2, %v111_v12 }

</bundles_post_ra>
